<compile_context>
chip_gen: v7x
topology: tpu7x:2x2x1
jax: 0.10.0
libtpu: 0.0.40
codegen_flags: <defaults>
</compile_context>

<pallas_src>
import numpy as np
import jax
import jax.numpy as jnp
from jax.experimental import pallas as pl
from jax.experimental.pallas import tpu as pltpu


def _concat_kernel(out1_ref, out2_ref, wT_ref, b_ref, o_ref):
    # 1x1 conv over channels == (C1, C2) @ (C2, S_tile) matmul with the big
    # spatial dim on the lane axis (lane-dense output), fused with bias add and
    # the elementwise residual add.
    y = jnp.dot(wT_ref[...], out2_ref[...], preferred_element_type=jnp.float32)
    o_ref[...] = (out1_ref[...] + y + b_ref[...]).astype(o_ref.dtype)


def _nearest_flat_indices(h_in, w_in, h_out, w_out):
    # PyTorch F.interpolate(mode='nearest'): src = floor(dst * in / out).
    # Pure integer arithmetic -> bit-exact, no fp boundary issues.
    h_idx = (np.arange(h_out) * h_in) // h_out
    w_idx = (np.arange(w_out) * w_in) // w_out
    return (h_idx[:, None] * w_in + w_idx[None, :]).reshape(-1).astype(np.int32)


def _pick_spatial_tile(S1, C1, C2, n_batch, *, max_tile=4096, vmem_budget=24 << 20):
    """Largest lane-dense spatial tile that fits the double-buffered VMEM budget."""
    if S1 <= 128:
        return S1
    # double-buffered f32 bytes per lane of tile: 2 * (out1 + out2 + out)
    per_lane = 2 * (C1 + C2 + C1) * 4
    st = min(max_tile, max(128, vmem_budget // per_lane), S1)
    st = max(128, (st // 128) * 128)
    # keep >= 2 total grid blocks so both v7x TensorCores get work
    while n_batch * pl.cdiv(S1, st) < 2 and st > 128:
        st = max(128, ((st // 2) // 128) * 128)
    return st


def concat_layer_forward(x, params, based_id=0, concat_id=1):
    """ConcatLayer.forward: out1 + nearest_resize(conv1x1(out2)); NCHW in/out."""
    out1 = x[based_id]           # (N, C1, H1, W1)  -- based_layer == identity
    out2 = x[concat_id]          # (N, C2, H2, W2)  -- concat_layer == identity
    w, b = params                # w: (C2, C1), b: (C1,)   (transformerconv 1x1)

    N, C1, H1, W1 = out1.shape
    _, C2, H2, W2 = out2.shape
    S1 = H1 * W1

    # Channel-major flatten: spatial goes to the last (lane) axis.  No transposes.
    out1_f = out1.reshape(N, C1, S1)
    out2_f = out2.reshape(N, C2, H2 * W2)

    # Nearest upsample as a static-index gather on the SMALL out2 only.
    # TODO(synk): could be fused into the kernel (jnp.take on a VMEM-resident
    # out2 block) to shave the remaining C2-sized extra HBM pass.
    flat_idx = jnp.asarray(_nearest_flat_indices(H2, W2, H1, W1))
    out2_up = jnp.take(out2_f, flat_idx, axis=2)            # (N, C2, S1)

    wT = jnp.asarray(w).T                                   # (C1, C2)
    b_col = jnp.asarray(b).reshape(C1, 1)                   # (C1, 1)

    st = _pick_spatial_tile(S1, C1, C2, N)
    grid = (N, pl.cdiv(S1, st))

    out_f = pl.pallas_call(
        _concat_kernel,
        out_shape=jax.ShapeDtypeStruct((N, C1, S1), out1.dtype),
        grid_spec=pltpu.PrefetchScalarGridSpec(
            num_scalar_prefetch=0,
            grid=grid,
            in_specs=[
                pl.BlockSpec((None, C1, st), lambda n, s: (n, 0, s)),  # out1 tile
                pl.BlockSpec((None, C2, st), lambda n, s: (n, 0, s)),  # upsampled out2 tile
                pl.BlockSpec((C1, C2), lambda n, s: (0, 0)),           # conv weight^T (full)
                pl.BlockSpec((C1, 1), lambda n, s: (0, 0)),            # conv bias (full)
            ],
            out_specs=pl.BlockSpec((None, C1, st), lambda n, s: (n, 0, s)),
        ),
        compiler_params=pltpu.CompilerParams(
            dimension_semantics=("parallel", "parallel"),
            vmem_limit_bytes=32 * 1024 * 1024,
        ),
    )(out1_f, out2_up, wT, b_col)

    return out_f.reshape(N, C1, H1, W1)   # still NCHW; pure reshape, no transpose


if __name__ == "__main__":
    key = jax.random.PRNGKey(0)
    k1, k2, k3, k4 = jax.random.split(key, 4)

    # x is the list of feature maps the module indexes into (NCHW).
    N, C1, H1, W1 = 2, 8, 16, 16        # based feature  (x[based_id])
    C2, H2, W2 = 4, 8, 8                # concat feature (x[concat_id])
    feat0 = jax.random.normal(k1, (N, C1, H1, W1), jnp.float32)
    feat1 = jax.random.normal(k2, (N, C2, H2, W2), jnp.float32)

    # transformerconv = Conv2d(C2, C1, kernel_size=1): deterministic synthetic params.
    # TODO(synk): PyTorch re-instantiates this conv on every forward (fresh random
    # weights each call); here the weights are fixed deterministic constants.
    w = 0.1 * jax.random.normal(k3, (C2, C1), jnp.float32)
    b = 0.1 * jax.random.normal(k4, (C1,), jnp.float32)

    out = concat_layer_forward([feat0, feat1], (w, b))
    out = jax.block_until_ready(out)

    # Pure-JAX reference (conv1x1 -> nearest resize -> add), NCHW.
    h_idx = (np.arange(H1) * H2) // H1
    w_idx = (np.arange(W1) * W2) // W1
    conv = jnp.einsum("nchw,cd->ndhw", feat1, w) + b[None, :, None, None]
    ref = feat0 + conv[:, :, h_idx][:, :, :, w_idx]

    assert out.shape == (N, C1, H1, W1)
    assert jnp.allclose(out, ref, atol=1e-5, rtol=1e-5)
    print("KERNEL_OK")
</pallas_src>

<mosaic_0001>
module attributes {stable_mosaic.version = 11 : i64} {
  func.func @_concat_kernel(%arg0: i32, %arg1: i32, %arg2: memref<1x8x256xf32, #tpu.memory_space<vmem>>, %arg3: memref<1x4x256xf32, #tpu.memory_space<vmem>>, %arg4: memref<8x4xf32, #tpu.memory_space<vmem>>, %arg5: memref<8x1xf32, #tpu.memory_space<vmem>>, %arg6: memref<1x8x256xf32, #tpu.memory_space<vmem>>) attributes {dimension_semantics = [#tpu.dimension_semantics<parallel>, #tpu.dimension_semantics<parallel>], iteration_bounds = array<i64: 2, 1>, scalar_prefetch = 0 : i64, scratch_operands = 0 : i64, tpu.core_type = #tpu.core_type<tc>, window_params = [{transform_indices = @transform_0, window_bounds = array<i64: 1, 8, 256>}, {transform_indices = @transform_1, window_bounds = array<i64: 1, 4, 256>}, {pipeline_mode = #tpu.pipeline_mode<synchronous>, transform_indices = @transform_2, window_bounds = array<i64: 8, 4>}, {pipeline_mode = #tpu.pipeline_mode<synchronous>, transform_indices = @transform_3, window_bounds = array<i64: 8, 1>}, {transform_indices = @transform_4, window_bounds = array<i64: 1, 8, 256>}]} {
    %c0 = arith.constant 0 : index
    %c0_0 = arith.constant 0 : index
    %0 = vector.load %arg4[%c0, %c0_0] : memref<8x4xf32, #tpu.memory_space<vmem>>, vector<8x4xf32>
    %c0_1 = arith.constant 0 : index
    %c0_2 = arith.constant 0 : index
    %c0_3 = arith.constant 0 : index
    %1 = vector.load %arg3[%c0_1, %c0_2, %c0_3] : memref<1x4x256xf32, #tpu.memory_space<vmem>>, vector<1x4x256xf32>
    %2 = vector.shape_cast %1 : vector<1x4x256xf32> to vector<4x256xf32>
    %cst = arith.constant dense<0.000000e+00> : vector<8x256xf32>
    %3 = tpu.matmul %0, %2, %cst {dimension_numbers = #tpu.dot_dimension_numbers<[1], [0], [0], [1], [0, 0, 1, 1], [], []>} : vector<8x4xf32>, vector<4x256xf32>, vector<8x256xf32> -> vector<8x256xf32>
    %c0_4 = arith.constant 0 : index
    %c0_5 = arith.constant 0 : index
    %c0_6 = arith.constant 0 : index
    %4 = vector.load %arg2[%c0_4, %c0_5, %c0_6] : memref<1x8x256xf32, #tpu.memory_space<vmem>>, vector<1x8x256xf32>
    %5 = vector.shape_cast %4 : vector<1x8x256xf32> to vector<8x256xf32>
    %6 = arith.addf %5, %3 : vector<8x256xf32>
    %c0_7 = arith.constant 0 : index
    %c0_8 = arith.constant 0 : index
    %7 = vector.load %arg5[%c0_7, %c0_8] : memref<8x1xf32, #tpu.memory_space<vmem>>, vector<8x1xf32>
    %8 = vector.broadcast %7 : vector<8x1xf32> to vector<8x256xf32>
    %9 = arith.addf %6, %8 : vector<8x256xf32>
    %c0_9 = arith.constant 0 : index
    %c0_10 = arith.constant 0 : index
    %c0_11 = arith.constant 0 : index
    %10 = vector.load %arg6[%c0_9, %c0_10, %c0_11] : memref<1x8x256xf32, #tpu.memory_space<vmem>>, vector<1x8x256xf32>
    %11 = vector.shape_cast %10 : vector<1x8x256xf32> to vector<8x256xf32>
    %12 = vector.shape_cast %9 : vector<8x256xf32> to vector<1x8x256xf32>
    tpu.vector_store %arg6[%c0_9, %c0_10, %c0_11], %12 {strides = array<i32>} : memref<1x8x256xf32, #tpu.memory_space<vmem>>, vector<1x8x256xf32>,
    return
  }
  func.func @transform_0(%arg0: i32, %arg1: i32) -> (i32, i32, i32) {
    %c0_i32 = arith.constant 0 : i32
    %c0_i32_0 = arith.constant 0 : i32
    return %arg0, %c0_i32, %arg1 : i32, i32, i32
  }
  func.func @transform_1(%arg0: i32, %arg1: i32) -> (i32, i32, i32) {
    %c0_i32 = arith.constant 0 : i32
    %c0_i32_0 = arith.constant 0 : i32
    return %arg0, %c0_i32, %arg1 : i32, i32, i32
  }
  func.func @transform_2(%arg0: i32, %arg1: i32) -> (i32, i32) {
    %c0_i32 = arith.constant 0 : i32
    %c0_i32_0 = arith.constant 0 : i32
    %c0_i32_1 = arith.constant 0 : i32
    return %c0_i32, %c0_i32_0 : i32, i32
  }
  func.func @transform_3(%arg0: i32, %arg1: i32) -> (i32, i32) {
    %c0_i32 = arith.constant 0 : i32
    %c0_i32_0 = arith.constant 0 : i32
    %c0_i32_1 = arith.constant 0 : i32
    return %c0_i32, %c0_i32_0 : i32, i32
  }
  func.func @transform_4(%arg0: i32, %arg1: i32) -> (i32, i32, i32) {
    %c0_i32 = arith.constant 0 : i32
    %c0_i32_0 = arith.constant 0 : i32
    return %arg0, %c0_i32, %arg1 : i32, i32, i32
  }
}

</mosaic_0001>

<bundles_post_ra>
// kernel: tpu_custom_call.1
= control target key start
LH: loop header
LB: loop body
LE: loop exit
PB: predicated region body
PF: predicated region fallthrough
CT: control target
= control target key end

     0   :  { %9 = vsyncpa [#allocation3], 0  ;;  %s906_s0 = inlined_call_operand.hbm [shape: f32[2,8,256], index: 0, kind: input, shape index: {}]   ;;  %s907_s1 = inlined_call_operand.vmem [shape: f32[2,4,256], index: 1, kind: input, shape index: {}]   ;;  %s908_s2 = inlined_call_operand.vmem [shape: f32[8,4], index: 2, kind: input, shape index: {}]   ;;  %s909_s3 = inlined_call_operand.vmem [shape: f32[8,1], index: 3, kind: input, shape index: {}]   ;;  %s910_s4 = inlined_call_operand.hbm [shape: f32[2,8,256], index: 4, kind: output, shape index: {}]  }
   0x1   :  { %11 = vsyncpa [#allocation3 + $0x1], 0 }
   0x2   :  { %12 = vsyncpa [#allocation4], 0 }
   0x3   :  { %14 = vsyncpa [#allocation4 + $0x1], 0  ;;  %s719_s15 = smov 0   ;;  %s721_s16 = smov 0  }
   0x4   :  { %s723_s17 = smov 0   ;;  %s725_s18 = smov 0  }
   0x5   :  { %s727_s19 = smov 0   ;;  %s729_s20 = smov 0  }
   0x6 LB: > { %s487_s21 = sadd.s32 4294967295, %s688_s20   ;;  %s488_s22 = sadd.s32 4294967294, %s688_s20   ;;  %s688_s20 = sphi %s729_s20, %s20_s20   ;;  %s684_s19 = sphi %s727_s19, %s926_s19   ;;  %s680_s18 = sphi %s725_s18, %s925_s18   ;;  %s676_s17 = sphi %s723_s17, %s924_s17   ;;  %s672_s16 = sphi %s721_s16, %s923_s16   ;;  %s668_s15 = sphi %s719_s15, %s922_s15  }
   0x7   : > { %s32_s23 = sadd.s32 1, %s684_s19  ;;  %s41_s24 = sadd.s32 1, %s676_s17 }
   0x8   : > { %p34_p0 = scmp.ge.s32.totalorder %s32_s23, 2  ;;  %p48_p1 = scmp.ne.s32.totalorder %s676_s17, %s672_s16 }
   0x9   : > { %p49_p2 = scmp.eq.s32.totalorder %s688_s20, 0  ;;  %p54_p3 = scmp.ne.s32.totalorder %s672_s16, %s668_s15 }
   0xa   : > { %s928_s23 = smov (%p34_p0, %s32_s23), 0  ;;  %p55_p5 = scmp.eq.s32.totalorder %s487_s21, 0 }
   0xb   : > { %p760_p4 = por %p49_p2, %p48_p1  ;;  %s36_s26 = ssub.s32 %s684_s19, %s928_s23 }
   0xc   : > { %p150_p6 = scmp.eq.s32.totalorder %s487_s21, 1  ;;  %p39_p7 = scmp.eq.s32.totalorder %s36_s26, 0 }
   0xd   : > { %p766_p8 = por %p55_p5, %p54_p3  ;;  %p156_p10 = scmp.eq.s32.totalorder %s488_s22, 1 }
   0xe   : > { %p770_p9 = por %p150_p6, %p48_p1  ;;  %p522_p13 = scmp.lt.s32.totalorder %s688_s20, 2 }
   0xf   : > { %s775_s29 = scalar_select %p39_p7, %s676_s17, %s41_s24  }
  0x10   : > { %s914_s28 = scalar_select %p770_p9, 1, 0 }
  0x11   : > { %p777_p11 = por %p156_p10, %p54_p3  ;;  %s182_s5 = sand.u32 1, %s676_s17  }
  0x12   : > { %s491_s6 = sshll.u32 %s182_s5, 4  ;;  %s507_s7 = sshll.u32 %s684_s19, 8 }
  0x13   : > { %s915_s30 = scalar_select %p777_p11, 1, 0 }
  0x14   : > { %s788_s10 = scalar_lea.hbm %s906_s0, %s507_s7  ;;  %s186_s11 = scalar_lea.vmem [#allocation2], %s491_s6 }
  0x15   : > { %s196_s12 = sshll.u32 %s186_s11, 4  ;;  %p794_p0 = pnand %p522_p13, %p760_p4  ;;  %s790_s12 = int_to_ptr.vmem [resolvable:$true] %s196_s12 }
  0x16   : > { %s183_s14 = scalar_lea.sflag [#allocation3], %s182_s5  ;;  %s576_s21 = scalar_lea.hbm %s788_s10, 256 }
  0x17   : > { %p577_p3 = scmp.ne.s32.totalorder %s788_s10, %s576_s21  ;;  %p578_p5 = pneg %p794_p0 }
  0x18   : > { %s581_s25 = scalar_lea.hbm %s906_s0, 512  ;;  %p582_p4 = scmp.lt.u32.totalorder %s788_s10, %s906_s0 }
  0x19   : > { %p579_p6 = pnand %p578_p5, %p577_p3  ;;  %p583_p10 = scmp.lt.u32.totalorder %s581_s25, %s576_s21 }
  0x1a   : > { %p585_p12 = scmp.lt.u32.totalorder %s576_s21, %s788_s10 }
  0x1b   : > { %p580_p7 = pneg %p579_p6  ;;  %p584_p13 = por %p583_p10, %p582_p4 }
  0x1d   : > { %p586_p1 = por %p585_p12, %p584_p13 }
  0x1f   : > { %p587_p2 = pnand %p586_p1, %p580_p7 }
  0x21   : > { %590 = shalt.err (!%p587_p2)
}
  0x22   : > { %s591_s5 = scalar_lea.vmem %s790_s12, 256  ;;  %s690_s7 = smov [#allocation2]  }
  0x23   : > { %p592_p3 = scmp.ne.s32.totalorder %s790_s12, %s591_s5  ;;  %s596_s8 = sshll.u32 %s690_s7, 4  ;;  %s597_s8 = int_to_ptr.vmem [resolvable:$false] %s596_s8 }
  0x24   : > { %s598_s9 = scalar_lea.vmem %s597_s8, 512  ;;  %p599_p9 = scmp.lt.s32.totalorder %s790_s12, %s597_s8 }
  0x25   : > { %p594_p6 = pnand %p592_p3, %p578_p5  ;;  %p600_p4 = scmp.lt.s32.totalorder %s598_s9, %s591_s5 }
  0x27   : > { %p595_p11 = pneg %p594_p6  ;;  %p601_p10 = por %p600_p4, %p599_p9 }
  0x29   : > { %p602_p12 = pnand %p601_p10, %p595_p11 }
  0x2b   : > { %605 = shalt.err (!%p602_p12)
}
  0x2c   : > { %517 = dma.hbm_to_vmem [thread:$0]  (!%p794_p0), %s788_s10, 256, %s790_s12, %s183_s14  }
  0x2d   : > { %p917_p1 = scmp.lt.s32.totalorder %s688_s20, 3  ;;  %p918_p2 = scmp.ge.s32.totalorder %s688_s20, 1 }
  0x2f   : > { %p215_p5 = pnand %p918_p2, %p917_p1 }
  0x30   : > { %s830_s11 = sand.u32 (!%p215_p5), 1, %s672_s16  }
  0x31   : > { %218 = sbr.rel (%p215_p5) target bundleno = 299 (0x12b), region = 36  ;;  %s495_s21 = sshll.u32 (!%p215_p5), %s830_s11, 4 }
  0x32   : > { %s221_s22 = scalar_lea.sflag (!%p215_p5), [#allocation3], %s830_s11  ;;  %s224_s13 = scalar_lea.vmem (!%p215_p5), [#allocation2], %s495_s21 }
  0x38   : > { %659 = dma.done.wait (%p766_p8), %s221_s22, 256  }
  0x39   : > { %661 = vsyncadd (%p766_p8), %s221_s22, 4294967040  ;;  %p260_p9 = scmp.lt.s32.totalorder %s680_s18, 1  ;;  %v691_v0 = vmov 0.0   ;;  %v692_v1 = vmov 0   ;;  %vm278_vm0 = vcmask 1043456   ;;  %v358_v3 = vld [vmem:[%s909_s3] sm:$0xff] }
  0x3a   : > { %347 = vmatprep.mubr.f32.mxu0 %v691_v0  ;;  %574 = vset.pattern.permute.xlu0 %v692_v1  ;;  %v270_v5 = vld [vmem:[%s908_s2] sm:$0xff]  ;;  %vm274_vm1 = vcmask 31744   ;;  %v355_v7 = vld [vmem:[%s224_s13 + $0x8] sm:$0xff]  ;;  %s509_s7 = sshll.u32 %s680_s18, 8  ;;  %s257_s8 = scalar_lea.vmem [#allocation5], %s495_s21 }
  0x3b   : > { %s261_s10 = scalar_select %p260_p9, %s680_s18, 1  ;;  %361 = vperm.xlu0 %574, %v358_v3   ;;  %v354_v6 = vld [vmem:[%s224_s13] sm:$0xff] }
  0x3c   : > { %s385_s9 = sshll.u32 %s257_s8, 4  ;;  %s369_s13 = scalar_lea.sflag [#allocation4], %s830_s11  ;;  %s859_s9 = int_to_ptr.vmem [resolvable:$true] %s385_s9 }
  0x3d   : > { %s508_s12 = sshll.u32 %s261_s10, 3  ;;  %s606_s18 = scalar_lea.vmem %s859_s9, 256 }
  0x3e   : > { %s267_s25 = scalar_lea.vmem %s907_s1, %s508_s12  ;;  %s857_s12 = scalar_lea.hbm %s910_s4, %s509_s7 }
  0x3f   : > { %v271_v2 = vld [vmem:[%s267_s25] sm:$0xff]  ;;  %p607_p8 = scmp.ne.s32.totalorder %s859_s9, %s606_s18  ;;  %p919_p11 = scmp.ne.s32.totalorder %s914_s28, 0 }
  0x40   : > { %v273_v4 = vcombine.high %v271_v2, %v271_v2  ;;  %s693_s21 = smov [#allocation5]  }
  0x41   : > { %p608_p0 = pnand %p607_p8, %p919_p11  ;;  %s610_s14 = sshll.u32 %s693_s21, 4  ;;  %s611_s14 = int_to_ptr.vmem [resolvable:$false] %s610_s14 }
  0x42   : > { %499 = vmatprep.subr.msk.mxu0 %vm278_vm0, %v273_v4  ;;  %s612_s24 = scalar_lea.vmem %s611_s14, 512  ;;  %p613_p13 = scmp.lt.s32.totalorder %s859_s9, %s611_s14 }
  0x43   : > { %500 = vmatpush1.msk.msra.mxu0 %vm278_vm0, %v271_v2  ;;  %p609_p7 = pneg %p608_p0  ;;  %p614_p3 = scmp.lt.s32.totalorder %s612_s24, %s606_s18 }
  0x44   : > { %501 = vmatmul.mubr.msk.f32.vlgmr.msra.gmra.mrb[0].mxu0 %vm274_vm1, %v270_v5 }
  0x45   : > { %p615_p6 = por %p614_p3, %p613_p13 }
  0x47   : > { %p616_p4 = pnand %p615_p6, %p609_p7 }
  0xba   : > { %v362_v9 = vpop.permute.xlu0 %361 }
 0x117   : > { %v349_v8 = vpop.f32.mrb[0].mxu0 }
 0x118   : > { %v356_v10 = vadd.f32 %v354_v6, %v349_v8  ;;  %v351_v11 = vpop.f32.mrb[1].mxu0 }
 0x119   : > { %v357_v12 = vadd.f32 %v355_v7, %v351_v11 }
 0x11a   : > { %v364_v13 = vadd.f32 %v362_v9, %v356_v10 }
 0x11b   : > { %v365_v14 = vadd.f32 %v362_v9, %v357_v12 }
 0x11c   : > { %366 = vst [vmem:[%s257_s8] sm:$0xff] %v364_v13 }
 0x11d   : > { %367 = vst [vmem:[%s257_s8 + $0x8] sm:$0xff] %v365_v14 }
 0x11e   : > { %619 = shalt.err (!%p616_p4)
}
 0x11f   : > { %s620_s11 = scalar_lea.hbm %s857_s12, 256  ;;  %s624_s6 = scalar_lea.hbm %s910_s4, 512 }
 0x120   : > { %p621_p10 = scmp.ne.s32.totalorder %s857_s12, %s620_s11  ;;  %p625_p2 = scmp.lt.u32.totalorder %s857_s12, %s910_s4 }
 0x121   : > { %p626_p5 = scmp.lt.u32.totalorder %s624_s6, %s620_s11  ;;  %p628_p8 = scmp.lt.u32.totalorder %s620_s11, %s857_s12 }
 0x122   : > { %p622_p12 = pnand %p621_p10, %p919_p11 }
 0x123   : > { %p627_p9 = por %p626_p5, %p625_p2 }
 0x124   : > { %p623_p1 = pneg %p622_p12 }
 0x125   : > { %p629_p0 = por %p628_p8, %p627_p9 }
 0x127   : > { %p630_p7 = pnand %p629_p0, %p623_p1 }
 0x129   : > { %633 = shalt.err (!%p630_p7)
}
 0x12a   : > { %512 = dma.vmem_to_hbm [thread:$0]  (%p919_p11), %s859_s9, 256, %s857_s12, %s369_s13  }
 0x12b PF: > { %s397_s7 = sand.u32 1, %s668_s15   ;;  %p920_p13 = scmp.ne.s32.totalorder %s915_s30, 0 }
 0x12c   : > { %p921_p3 = scmp.ge.s32.totalorder %s688_s20, 2  ;;  %s398_s8 = scalar_lea.sflag [#allocation4], %s397_s7 }
 0x12e   : > { %p519_p6 = pnand %p921_p3, %p920_p13 }
 0x130   : > { %663 = dma.done.wait (!%p519_p6), %s398_s8, 256  }
 0x131   : > { %665 = vsyncadd (!%p519_p6), %s398_s8, 4294967040  ;;  %s20_s20 = sadd.s32 1, %s688_s20   ;;  %s922_s15 = smov %s672_s16 }
 0x132   : > { %p17_p4 = scmp.ge.s32.totalorder %s20_s20, 4   ;;  %s923_s16 = smov %s676_s17 }
 0x133   : > { %s924_s17 = smov %s775_s29  ;;  %s925_s18 = smov %s684_s19 }
 0x134   : > { %s926_s19 = smov %s928_s23  ;;  %19 = sbr.rel (!%p17_p4) target bundleno = 6 (0x6), region = 84 }
 0x13b   :  { %403 = vsyncpa [#allocation3], 1 }
 0x13c   :  { %405 = vsyncpa [#allocation3 + $0x1], 1 }
 0x13d   :  { %406 = vsyncpa [#allocation4], 1 }
 0x13e   :  { %408 = vsyncpa [#allocation4 + $0x1], 1 }

</bundles_post_ra>
